<compile_context>
chip_gen: v5e
topology: v5e:2x2
jax: 0.10.0
libtpu: 0.0.40
codegen_flags: <defaults>
</compile_context>

<pallas_src>
import math
import functools

import jax
import jax.numpy as jnp
import numpy as np
from jax.experimental import pallas as pl
from jax.experimental.pallas import tpu as pltpu


def block_kernel(n_ref,           # scalar-prefetch: lengths (Bp,) in SMEM
                 h_ref,           # (Cp, L)     packed input tile (row C = depth channel), L = Bb*T
                 w1_ref,          # (2Cp, K*Cp) conv1 weights: rows [0,Cp)=left, [Cp,2Cp)=right
                 b1_ref,          # (2Cp, 1)
                 w2_ref,          # (Cp, K*Cp)  conv2 weights (padded to Cp out rows)
                 b2_ref,          # (Cp, 1)
                 o_ref,           # (Cp, L) output tile
                 col_ref,         # VMEM scratch (K*Cp, L): shared im2col buffer
                 *, channels, cpad, kernel_size, depth_val, leak, bb, t_len, precision):
    C, Cp, K, Bb, T = channels, cpad, kernel_size, bb, t_len
    L = Bb * T
    P = K // 2
    g = pl.program_id(0)

    # Lane bookkeeping: within-sample time index and per-sample segment masks.
    lane = jax.lax.broadcasted_iota(jnp.int32, (1, L), 1)
    tt = lane % T                                          # time index inside each sample

    valid = jnp.zeros((1, L), jnp.float32)                 # t < N[sample] mask
    seg_inds = []                                          # per-sample lane indicators
    denoms = []                                            # guarded C*N[sample] counts
    for s in range(Bb):
        n_s = n_ref[g * Bb + s]
        seg_f = jnp.logical_and(lane >= s * T, lane < (s + 1) * T).astype(jnp.float32)
        seg_inds.append(seg_f)
        valid = valid + seg_f * (tt < n_s).astype(jnp.float32)
        denoms.append(jnp.maximum((C * n_s).astype(jnp.float32), 1.0))   # guard N == 0

    # Per-tap edge masks: keep column only if 0 <= tt + (k - P) < T ("SAME" zero
    # padding); this also kills cross-sample leakage from the packed-lane roll.
    edge = []
    for k in range(K):
        d = k - P
        if d == 0:
            edge.append(None)
        else:
            lo, hi = max(-d, 0), T - max(d, 0)
            edge.append(jnp.logical_and(tt >= lo, tt < hi).astype(jnp.float32))

    row_i = jax.lax.broadcasted_iota(jnp.int32, (Cp, 1), 0)
    row_mask = (row_i < C).astype(jnp.float32)             # real (non-pad) channel rows
    depth_row = (row_i == C).astype(jnp.float32)
    mask_cv = row_mask * valid                             # (Cp, L): real rows & valid t

    def fill_im2col(x_full):
        # K tap-shifted copies stacked along sublanes into the shared VMEM scratch
        # so each conv is a single MXU matmul with contraction dim K*Cp.
        for k in range(K):
            d = k - P
            rows = slice(k * Cp, (k + 1) * Cp)
            if d == 0:
                col_ref[rows, :] = x_full
            else:
                col_ref[rows, :] = pltpu.roll(x_full, shift=(-d) % L, axis=1) * edge[k]

    def masked_ln(x, mask2d, eps=1e-5):
        # One-pass masked LayerNorm per packed sample: sum and sumsq computed
        # together, var = E[x^2] - mean^2 (no separate centering pass).
        xm = x * mask2d
        mean_full = jnp.zeros((1, L), jnp.float32)
        inv_full = jnp.zeros((1, L), jnp.float32)
        for s in range(Bb):
            sl = slice(s * T, (s + 1) * T)                 # static, 128-aligned lane slice
            xs = xm[:, sl]
            s1 = jnp.sum(xs)
            s2 = jnp.sum(xs * xs)
            mean = s1 / denoms[s]
            var = jnp.maximum(s2 / denoms[s] - mean * mean, 0.0)
            inv = jax.lax.rsqrt(var + eps)
            mean_full = mean_full + seg_inds[s] * mean
            inv_full = inv_full + seg_inds[s] * inv
        return (xm - mean_full * mask2d) * inv_full

    def act(v):                                            # ReLU / LeakyReLU
        return jnp.maximum(v, leak * v)

    # Masked input (depth channel pre-filled at row C host-side; rows > C are zero).
    x_full = h_ref[...] * valid                            # (Cp, L)

    # conv1: left + right halves fused into one matmul (DEFAULT precision: bf16 MXU,
    # f32 accumulate -- both LayerNorms make the block scale-tolerant).
    fill_im2col(x_full)
    out1 = jnp.dot(w1_ref[...], col_ref[...],
                   preferred_element_type=jnp.float32, precision=precision)
    out1 = out1 + b1_ref[...]                              # (2Cp, L)
    l = out1[:Cp]                                          # left half (pad rows are 0)

    r = act(masked_ln(out1[Cp:], mask_cv))                 # norm1 + act (pad rows stay 0)

    # Re-append the (masked) depth channel at row C, then conv2.
    r_full = r + depth_row * (depth_val * valid)
    fill_im2col(r_full)
    out2 = jnp.dot(w2_ref[...], col_ref[...],
                   preferred_element_type=jnp.float32, precision=precision)
    out2 = out2 + b2_ref[...]                              # (Cp, L)
    r2 = masked_ln(out2, mask_cv)                          # norm2 (pad rows -> 0)

    o_ref[...] = l + act(r2)                               # residual add; pad rows stay 0


def block_forward(h, N, depth, w1, b1, w2, b2, leak=0.0,
                  samples_per_step=None, precision=None):
    """h: (B, C, T) f32, N: (B,) i32 lengths, depth: python int.
       w1: (2C, C+1, K), b1: (2C,), w2: (C, C+1, K), b2: (C,)."""
    B, C, T = h.shape
    Cout1, Cin, K = w1.shape
    assert Cout1 == 2 * C and Cin == C + 1 and K % 2 == 1
    Cp = ((Cin + 7) // 8) * 8                 # pad channel dim to the sublane tile
    dval = float(math.log1p(depth))

    # Pack Bb samples per grid step along the lane axis (lane-dense output stores,
    # one wide matmul per conv, fewer ~0.35us grid steps).
    if samples_per_step is None:
        bb = max(1, 1024 // T) if T < 1024 else 1
        bb = min(bb, max(1, (8 << 20) // (K * Cp * T * 4)))   # keep im2col scratch modest
        samples_per_step = max(1, min(B, bb))
    Bb = int(samples_per_step)
    G = -(-B // Bb)                            # grid steps (batch groups)
    Bp = G * Bb
    L = Bb * T

    h_f = h.astype(jnp.float32)
    if Bp > B:                                 # padded samples: zeros, N = 0 -> fully masked
        h_f = jnp.pad(h_f, ((0, Bp - B), (0, 0), (0, 0)))
    N_pad = jnp.pad(N.astype(jnp.int32), (0, Bp - B))

    # Input with the depth channel appended at row C plus zero rows up to Cp,
    # then Bb samples packed along lanes: (G, Cp, Bb*T).
    h_cp = jnp.concatenate(
        [h_f,
         jnp.full((Bp, 1, T), dval, jnp.float32),
         jnp.zeros((Bp, Cp - Cin, T), jnp.float32)], axis=1)          # (Bp, Cp, T)
    h_packed = h_cp.reshape(G, Bb, Cp, T).transpose(0, 2, 1, 3).reshape(G, Cp, L)

    def flat(w):
        # (Cout, Cin, K) -> (Cout, K*Cp); column index k*Cp + cin matches im2col rows.
        w_p = jnp.pad(w.astype(jnp.float32), ((0, 0), (0, Cp - Cin), (0, 0)))
        return jnp.transpose(w_p, (0, 2, 1)).reshape(w.shape[0], K * Cp)

    def pad_rows(a, rows):
        return jnp.pad(a, ((0, rows - a.shape[0]),) + ((0, 0),) * (a.ndim - 1))

    # conv1 packed as [left half (padded to Cp rows); right half (padded to Cp rows)].
    w1_packed = jnp.concatenate([pad_rows(flat(w1[:C]), Cp),
                                 pad_rows(flat(w1[C:]), Cp)], axis=0)                 # (2Cp, K*Cp)
    b1_packed = jnp.concatenate([pad_rows(b1[:C].astype(jnp.float32), Cp),
                                 pad_rows(b1[C:].astype(jnp.float32), Cp)])[:, None]  # (2Cp, 1)
    w2_packed = pad_rows(flat(w2), Cp)                                                # (Cp, K*Cp)
    b2_packed = pad_rows(b2.astype(jnp.float32), Cp)[:, None]                         # (Cp, 1)

    kernel = functools.partial(block_kernel, channels=C, cpad=Cp, kernel_size=K,
                               depth_val=dval, leak=float(leak), bb=Bb, t_len=T,
                               precision=precision)

    # Explicit VMEM budget: double-buffered in/out tiles + im2col scratch +
    # weights + kernel temporaries, with 2x headroom (never below 16 MiB).
    tile = Cp * L * 4
    weight_bytes = (2 * Cp * K * Cp + 2 * Cp + Cp * K * Cp + Cp) * 4
    est = 4 * tile + 2 * weight_bytes + K * Cp * L * 4 + 12 * tile
    vmem_limit = int(min(100 << 20, max(16 << 20, 2 * est)))

    # TODO(synk): for very large C*T add a T-tile grid axis (halo of K//2 columns,
    #             "arbitrary" semantics, two-pass masked LN) or per-tap accumulating
    #             matmuls to fit v7x's 64 MiB VMEM; weight specs could then be
    #             single-buffered (pipeline_mode=pl.Buffered(1)).
    out_packed = pl.pallas_call(
        kernel,
        out_shape=jax.ShapeDtypeStruct((G, Cp, L), jnp.float32),
        grid_spec=pltpu.PrefetchScalarGridSpec(
            num_scalar_prefetch=1,
            grid=(G,),
            in_specs=[
                pl.BlockSpec((None, Cp, L), lambda g, n: (g, 0, 0)),
                pl.BlockSpec((2 * Cp, K * Cp), lambda g, n: (0, 0)),
                pl.BlockSpec((2 * Cp, 1), lambda g, n: (0, 0)),
                pl.BlockSpec((Cp, K * Cp), lambda g, n: (0, 0)),
                pl.BlockSpec((Cp, 1), lambda g, n: (0, 0)),
            ],
            out_specs=pl.BlockSpec((None, Cp, L), lambda g, n: (g, 0, 0)),
            scratch_shapes=[pltpu.VMEM((K * Cp, L), jnp.float32)],
        ),
        compiler_params=pltpu.CompilerParams(
            dimension_semantics=("parallel",),   # batch groups are independent
            vmem_limit_bytes=vmem_limit),
    )(N_pad, h_packed, w1_packed, b1_packed, w2_packed, b2_packed)

    out = (out_packed.reshape(G, Cp, Bb, T)
           .transpose(0, 2, 1, 3)
           .reshape(Bp, Cp, T))[:B, :C]
    return out, N


def block_ref(h, N, depth, w1, b1, w2, b2, leak=0.0):
    """Pure-JAX reference with identical semantics (for correctness check)."""
    B, C, T = h.shape
    dval = jnp.float32(math.log1p(depth))
    t = jnp.arange(T)
    valid = (t[None, :] < N[:, None]).astype(jnp.float32)       # (B, T)

    def depth_cat_masked(x):
        d = jnp.full((B, 1, T), dval, jnp.float32)
        return jnp.concatenate([x, d], axis=1) * valid[:, None, :]

    def conv(x, w, bias):
        out = jax.lax.conv_general_dilated(
            x, w, window_strides=(1,), padding='SAME',
            dimension_numbers=('NCH', 'OIH', 'NCH'),
            precision=jax.lax.Precision.HIGHEST)
        return out + bias[None, :, None]

    def ln(r, eps=1e-5):
        cnt = jnp.maximum((C * N).astype(jnp.float32), 1.0)[:, None, None]
        vm = valid[:, None, :]
        mean = jnp.sum(r * vm, axis=(1, 2), keepdims=True) / cnt
        cen = (r - mean) * vm
        var = jnp.sum(cen * cen, axis=(1, 2), keepdims=True) / cnt
        return cen * jax.lax.rsqrt(var + eps)

    def act(v):
        return jnp.maximum(v, leak * v)

    hd = depth_cat_masked(h)
    lr = conv(hd, w1, b1)
    l, r = lr[:, :C], lr[:, C:]
    r = act(ln(r))
    rd = depth_cat_masked(r)
    r2 = ln(conv(rd, w2, b2))
    return l + act(r2)


if __name__ == "__main__":
    B, C, T, K = 2, 4, 128, 5
    depth = 2
    leak = 0.1                       # Generate default uses LeakyReLU(0.1)

    key = jax.random.PRNGKey(0)
    kh, k1, k2, k3, k4 = jax.random.split(key, 5)
    h = jax.random.normal(kh, (B, C, T), jnp.float32)
    N = jnp.array([128, 77], jnp.int32)

    Cin = C + 1                      # depth_variant=True adds one input channel
    bound = 1.0 / math.sqrt(Cin * K)
    w1 = jax.random.uniform(k1, (2 * C, Cin, K), jnp.float32, -bound, bound)
    b1 = jax.random.uniform(k2, (2 * C,), jnp.float32, -bound, bound)
    w2 = jax.random.uniform(k3, (C, Cin, K), jnp.float32, -bound, bound)
    b2 = jax.random.uniform(k4, (C,), jnp.float32, -bound, bound)

    out, n_out = block_forward(h, N, depth, w1, b1, w2, b2, leak=leak)
    out = jax.block_until_ready(out)

    ref = jax.block_until_ready(block_ref(h, N, depth, w1, b1, w2, b2, leak=leak))
    # Reference conv runs at HIGHEST precision; the kernel uses the MXU's native
    # bf16 path (per perf review), hence the slightly widened tolerance.
    if not np.allclose(np.asarray(out), np.asarray(ref), rtol=2e-2, atol=2e-2):
        err = float(np.max(np.abs(np.asarray(out) - np.asarray(ref))))
        raise AssertionError(f"Pallas kernel does not match JAX reference (max abs err {err})")
    print("KERNEL_OK")
</pallas_src>

<mosaic_0001>
module attributes {stable_mosaic.version = 11 : i64} {
  func.func @block_kernel(%arg0: i32, %arg1: memref<2xi32, #tpu.memory_space<smem>>, %arg2: memref<1x8x256xf32, #tpu.memory_space<vmem>>, %arg3: memref<16x40xf32, #tpu.memory_space<vmem>>, %arg4: memref<16x1xf32, #tpu.memory_space<vmem>>, %arg5: memref<8x40xf32, #tpu.memory_space<vmem>>, %arg6: memref<8x1xf32, #tpu.memory_space<vmem>>, %arg7: memref<1x8x256xf32, #tpu.memory_space<vmem>>, %arg8: memref<40x256xf32, #tpu.memory_space<vmem>>) attributes {dimension_semantics = [#tpu.dimension_semantics<parallel>], iteration_bounds = array<i64: 1>, scalar_prefetch = 1 : i64, scratch_operands = 1 : i64, tpu.core_type = #tpu.core_type<tc>, window_params = [{transform_indices = @transform_0, window_bounds = array<i64: 1, 8, 256>}, {pipeline_mode = #tpu.pipeline_mode<synchronous>, transform_indices = @transform_1, window_bounds = array<i64: 16, 40>}, {pipeline_mode = #tpu.pipeline_mode<synchronous>, transform_indices = @transform_2, window_bounds = array<i64: 16, 1>}, {pipeline_mode = #tpu.pipeline_mode<synchronous>, transform_indices = @transform_3, window_bounds = array<i64: 8, 40>}, {pipeline_mode = #tpu.pipeline_mode<synchronous>, transform_indices = @transform_4, window_bounds = array<i64: 8, 1>}, {transform_indices = @transform_5, window_bounds = array<i64: 1, 8, 256>}]} {
    %0 = tpu.iota {dimensions = array<i32: 1>} : vector<1x256xi32>
    %c128_i32 = arith.constant 128 : i32
    %c0_i32 = arith.constant 0 : i32
    %1 = arith.cmpi eq, %c128_i32, %c0_i32 : i32
    %c1_i32 = arith.constant 1 : i32
    %2 = arith.select %1, %c1_i32, %c128_i32 : i32
    %3 = vector.broadcast %2 : i32 to vector<1x256xi32>
    %4 = arith.remsi %0, %3 : vector<1x256xi32>
    %c0_i32_0 = arith.constant 0 : i32
    %5 = vector.broadcast %c0_i32_0 : i32 to vector<1x256xi32>
    %6 = arith.cmpi ne, %4, %5 : vector<1x256xi32>
    %c0_i32_1 = arith.constant 0 : i32
    %7 = vector.broadcast %c0_i32_1 : i32 to vector<1x256xi32>
    %8 = arith.cmpi slt, %4, %7 : vector<1x256xi32>
    %c0_i32_2 = arith.constant 0 : i32
    %9 = arith.cmpi slt, %2, %c0_i32_2 : i32
    %10 = vector.broadcast %9 : i1 to vector<1x256xi1>
    %11 = vector.broadcast %10 : vector<1x256xi1> to vector<1x256xi1>
    %12 = arith.xori %8, %11 : vector<1x256xi1>
    %13 = arith.andi %12, %6 : vector<1x256xi1>
    %14 = vector.broadcast %2 : i32 to vector<1x256xi32>
    %15 = arith.addi %4, %14 : vector<1x256xi32>
    %16 = arith.select %13, %15, %4 : vector<1x256xi1>, vector<1x256xi32>
    %cst = arith.constant 0.000000e+00 : f32
    %17 = vector.broadcast %cst : f32 to vector<1x256xf32>
    %c2_i32 = arith.constant 2 : i32
    %18 = arith.muli %arg0, %c2_i32 : i32
    %c0_i32_3 = arith.constant 0 : i32
    %19 = arith.addi %18, %c0_i32_3 : i32
    %20 = arith.index_cast %19 : i32 to index
    %21 = memref.load %arg1[%20] : memref<2xi32, #tpu.memory_space<smem>>
    %c0_i32_4 = arith.constant 0 : i32
    %22 = vector.broadcast %c0_i32_4 : i32 to vector<1x256xi32>
    %23 = arith.cmpi sge, %0, %22 : vector<1x256xi32>
    %c128_i32_5 = arith.constant 128 : i32
    %24 = vector.broadcast %c128_i32_5 : i32 to vector<1x256xi32>
    %25 = arith.cmpi slt, %0, %24 : vector<1x256xi32>
    %26 = arith.andi %23, %25 : vector<1x256xi1>
    %27 = arith.extui %26 : vector<1x256xi1> to vector<1x256xi32>
    %28 = arith.sitofp %27 : vector<1x256xi32> to vector<1x256xf32>
    %29 = vector.broadcast %21 : i32 to vector<1x256xi32>
    %30 = arith.cmpi slt, %16, %29 : vector<1x256xi32>
    %31 = arith.extui %30 : vector<1x256xi1> to vector<1x256xi32>
    %32 = arith.sitofp %31 : vector<1x256xi32> to vector<1x256xf32>
    %33 = arith.mulf %28, %32 : vector<1x256xf32>
    %34 = arith.addf %17, %33 : vector<1x256xf32>
    %c4_i32 = arith.constant 4 : i32
    %35 = arith.muli %c4_i32, %21 : i32
    %36 = arith.sitofp %35 : i32 to f32
    %cst_6 = arith.constant 1.000000e+00 : f32
    %37 = arith.maximumf %36, %cst_6 : f32
    %c2_i32_7 = arith.constant 2 : i32
    %38 = arith.muli %arg0, %c2_i32_7 : i32
    %c1_i32_8 = arith.constant 1 : i32
    %39 = arith.addi %38, %c1_i32_8 : i32
    %40 = arith.index_cast %39 : i32 to index
    %41 = memref.load %arg1[%40] : memref<2xi32, #tpu.memory_space<smem>>
    %c128_i32_9 = arith.constant 128 : i32
    %42 = vector.broadcast %c128_i32_9 : i32 to vector<1x256xi32>
    %43 = arith.cmpi sge, %0, %42 : vector<1x256xi32>
    %c256_i32 = arith.constant 256 : i32
    %44 = vector.broadcast %c256_i32 : i32 to vector<1x256xi32>
    %45 = arith.cmpi slt, %0, %44 : vector<1x256xi32>
    %46 = arith.andi %43, %45 : vector<1x256xi1>
    %47 = arith.extui %46 : vector<1x256xi1> to vector<1x256xi32>
    %48 = arith.sitofp %47 : vector<1x256xi32> to vector<1x256xf32>
    %49 = vector.broadcast %41 : i32 to vector<1x256xi32>
    %50 = arith.cmpi slt, %16, %49 : vector<1x256xi32>
    %51 = arith.extui %50 : vector<1x256xi1> to vector<1x256xi32>
    %52 = arith.sitofp %51 : vector<1x256xi32> to vector<1x256xf32>
    %53 = arith.mulf %48, %52 : vector<1x256xf32>
    %54 = arith.addf %34, %53 : vector<1x256xf32>
    %c4_i32_10 = arith.constant 4 : i32
    %55 = arith.muli %c4_i32_10, %41 : i32
    %56 = arith.sitofp %55 : i32 to f32
    %cst_11 = arith.constant 1.000000e+00 : f32
    %57 = arith.maximumf %56, %cst_11 : f32
    %c2_i32_12 = arith.constant 2 : i32
    %58 = vector.broadcast %c2_i32_12 : i32 to vector<1x256xi32>
    %59 = arith.cmpi sge, %16, %58 : vector<1x256xi32>
    %c128_i32_13 = arith.constant 128 : i32
    %60 = vector.broadcast %c128_i32_13 : i32 to vector<1x256xi32>
    %61 = arith.cmpi slt, %16, %60 : vector<1x256xi32>
    %62 = arith.andi %59, %61 : vector<1x256xi1>
    %63 = arith.extui %62 : vector<1x256xi1> to vector<1x256xi32>
    %64 = arith.sitofp %63 : vector<1x256xi32> to vector<1x256xf32>
    %c1_i32_14 = arith.constant 1 : i32
    %65 = vector.broadcast %c1_i32_14 : i32 to vector<1x256xi32>
    %66 = arith.cmpi sge, %16, %65 : vector<1x256xi32>
    %c128_i32_15 = arith.constant 128 : i32
    %67 = vector.broadcast %c128_i32_15 : i32 to vector<1x256xi32>
    %68 = arith.cmpi slt, %16, %67 : vector<1x256xi32>
    %69 = arith.andi %66, %68 : vector<1x256xi1>
    %70 = arith.extui %69 : vector<1x256xi1> to vector<1x256xi32>
    %71 = arith.sitofp %70 : vector<1x256xi32> to vector<1x256xf32>
    %c0_i32_16 = arith.constant 0 : i32
    %72 = vector.broadcast %c0_i32_16 : i32 to vector<1x256xi32>
    %73 = arith.cmpi sge, %16, %72 : vector<1x256xi32>
    %c127_i32 = arith.constant 127 : i32
    %74 = vector.broadcast %c127_i32 : i32 to vector<1x256xi32>
    %75 = arith.cmpi slt, %16, %74 : vector<1x256xi32>
    %76 = arith.andi %73, %75 : vector<1x256xi1>
    %77 = arith.extui %76 : vector<1x256xi1> to vector<1x256xi32>
    %78 = arith.sitofp %77 : vector<1x256xi32> to vector<1x256xf32>
    %c0_i32_17 = arith.constant 0 : i32
    %79 = vector.broadcast %c0_i32_17 : i32 to vector<1x256xi32>
    %80 = arith.cmpi sge, %16, %79 : vector<1x256xi32>
    %c126_i32 = arith.constant 126 : i32
    %81 = vector.broadcast %c126_i32 : i32 to vector<1x256xi32>
    %82 = arith.cmpi slt, %16, %81 : vector<1x256xi32>
    %83 = arith.andi %80, %82 : vector<1x256xi1>
    %84 = arith.extui %83 : vector<1x256xi1> to vector<1x256xi32>
    %85 = arith.sitofp %84 : vector<1x256xi32> to vector<1x256xf32>
    %86 = tpu.iota {dimensions = array<i32: 0>} : vector<8x1xi32>
    %c4_i32_18 = arith.constant 4 : i32
    %87 = vector.broadcast %c4_i32_18 : i32 to vector<8x1xi32>
    %88 = arith.cmpi slt, %86, %87 : vector<8x1xi32>
    %89 = arith.extui %88 : vector<8x1xi1> to vector<8x1xi32>
    %90 = arith.sitofp %89 : vector<8x1xi32> to vector<8x1xf32>
    %c4_i32_19 = arith.constant 4 : i32
    %91 = vector.broadcast %c4_i32_19 : i32 to vector<8x1xi32>
    %92 = arith.cmpi eq, %86, %91 : vector<8x1xi32>
    %93 = arith.extui %92 : vector<8x1xi1> to vector<8x1xi32>
    %94 = arith.sitofp %93 : vector<8x1xi32> to vector<8x1xf32>
    %95 = vector.broadcast %90 : vector<8x1xf32> to vector<8x256xf32>
    %96 = vector.broadcast %54 : vector<1x256xf32> to vector<8x256xf32>
    %97 = arith.mulf %95, %96 : vector<8x256xf32>
    %c0 = arith.constant 0 : index
    %c0_20 = arith.constant 0 : index
    %c0_21 = arith.constant 0 : index
    %98 = vector.load %arg2[%c0, %c0_20, %c0_21] : memref<1x8x256xf32, #tpu.memory_space<vmem>>, vector<1x8x256xf32>
    %99 = vector.shape_cast %98 : vector<1x8x256xf32> to vector<8x256xf32>
    %100 = vector.broadcast %54 : vector<1x256xf32> to vector<8x256xf32>
    %101 = arith.mulf %99, %100 : vector<8x256xf32>
    %c2_i32_22 = arith.constant 2 : i32
    %102 = tpu.dynamic_rotate %101 by %c2_i32_22 dim 1 : vector<8x256xf32>, i32 -> vector<8x256xf32>
    %103 = vector.broadcast %64 : vector<1x256xf32> to vector<8x256xf32>
    %104 = arith.mulf %102, %103 : vector<8x256xf32>
    %c0_23 = arith.constant 0 : index
    %c0_24 = arith.constant 0 : index
    %105 = vector.load %arg8[%c0_23, %c0_24] : memref<40x256xf32, #tpu.memory_space<vmem>>, vector<8x256xf32>
    tpu.vector_store %arg8[%c0_23, %c0_24], %104 {strides = array<i32>} : memref<40x256xf32, #tpu.memory_space<vmem>>, vector<8x256xf32>,
    %c1_i32_25 = arith.constant 1 : i32
    %106 = tpu.dynamic_rotate %101 by %c1_i32_25 dim 1 : vector<8x256xf32>, i32 -> vector<8x256xf32>
    %107 = vector.broadcast %71 : vector<1x256xf32> to vector<8x256xf32>
    %108 = arith.mulf %106, %107 : vector<8x256xf32>
    %c8 = arith.constant 8 : index
    %c0_26 = arith.constant 0 : index
    %109 = vector.load %arg8[%c8, %c0_26] : memref<40x256xf32, #tpu.memory_space<vmem>>, vector<8x256xf32>
    tpu.vector_store %arg8[%c8, %c0_26], %108 {strides = array<i32>} : memref<40x256xf32, #tpu.memory_space<vmem>>, vector<8x256xf32>,
    %c16 = arith.constant 16 : index
    %c0_27 = arith.constant 0 : index
    %110 = vector.load %arg8[%c16, %c0_27] : memref<40x256xf32, #tpu.memory_space<vmem>>, vector<8x256xf32>
    tpu.vector_store %arg8[%c16, %c0_27], %101 {strides = array<i32>} : memref<40x256xf32, #tpu.memory_space<vmem>>, vector<8x256xf32>,
    %c255_i32 = arith.constant 255 : i32
    %111 = tpu.dynamic_rotate %101 by %c255_i32 dim 1 : vector<8x256xf32>, i32 -> vector<8x256xf32>
    %112 = vector.broadcast %78 : vector<1x256xf32> to vector<8x256xf32>
    %113 = arith.mulf %111, %112 : vector<8x256xf32>
    %c24 = arith.constant 24 : index
    %c0_28 = arith.constant 0 : index
    %114 = vector.load %arg8[%c24, %c0_28] : memref<40x256xf32, #tpu.memory_space<vmem>>, vector<8x256xf32>
    tpu.vector_store %arg8[%c24, %c0_28], %113 {strides = array<i32>} : memref<40x256xf32, #tpu.memory_space<vmem>>, vector<8x256xf32>,
    %c254_i32 = arith.constant 254 : i32
    %115 = tpu.dynamic_rotate %101 by %c254_i32 dim 1 : vector<8x256xf32>, i32 -> vector<8x256xf32>
    %116 = vector.broadcast %85 : vector<1x256xf32> to vector<8x256xf32>
    %117 = arith.mulf %115, %116 : vector<8x256xf32>
    %c32 = arith.constant 32 : index
    %c0_29 = arith.constant 0 : index
    %118 = vector.load %arg8[%c32, %c0_29] : memref<40x256xf32, #tpu.memory_space<vmem>>, vector<8x256xf32>
    tpu.vector_store %arg8[%c32, %c0_29], %117 {strides = array<i32>} : memref<40x256xf32, #tpu.memory_space<vmem>>, vector<8x256xf32>,
    %c0_30 = arith.constant 0 : index
    %c0_31 = arith.constant 0 : index
    %119 = vector.load %arg3[%c0_30, %c0_31] : memref<16x40xf32, #tpu.memory_space<vmem>>, vector<16x40xf32>
    %c0_32 = arith.constant 0 : index
    %c0_33 = arith.constant 0 : index
    %120 = vector.load %arg8[%c0_32, %c0_33] : memref<40x256xf32, #tpu.memory_space<vmem>>, vector<40x256xf32>
    %cst_34 = arith.constant dense<0.000000e+00> : vector<16x256xf32>
    %121 = tpu.matmul %119, %120, %cst_34 {dimension_numbers = #tpu.dot_dimension_numbers<[1], [0], [0], [1], [0, 0, 1, 1], [], []>} : vector<16x40xf32>, vector<40x256xf32>, vector<16x256xf32> -> vector<16x256xf32>
    %c0_35 = arith.constant 0 : index
    %c0_36 = arith.constant 0 : index
    %122 = vector.load %arg4[%c0_35, %c0_36] : memref<16x1xf32, #tpu.memory_space<vmem>>, vector<16x1xf32>
    %123 = vector.broadcast %122 : vector<16x1xf32> to vector<16x256xf32>
    %124 = arith.addf %121, %123 : vector<16x256xf32>
    %125 = vector.extract_strided_slice %124 {offsets = [0, 0], sizes = [8, 256], strides = [1, 1]} : vector<16x256xf32> to vector<8x256xf32>
    %126 = vector.extract_strided_slice %124 {offsets = [8, 0], sizes = [8, 256], strides = [1, 1]} : vector<16x256xf32> to vector<8x256xf32>
    %127 = arith.mulf %126, %97 : vector<8x256xf32>
    %cst_37 = arith.constant 0.000000e+00 : f32
    %128 = vector.broadcast %cst_37 : f32 to vector<1x256xf32>
    %cst_38 = arith.constant 0.000000e+00 : f32
    %129 = vector.broadcast %cst_38 : f32 to vector<1x256xf32>
    %130 = vector.extract_strided_slice %127 {offsets = [0, 0], sizes = [8, 128], strides = [1, 1]} : vector<8x256xf32> to vector<8x128xf32>
    %131 = vector.shape_cast %130 : vector<8x128xf32> to vector<1x8x128xf32>
    %cst_39 = arith.constant dense<0.000000e+00> : vector<1xf32>
    %132 = vector.multi_reduction <add>, %131, %cst_39 [1, 2] : vector<1x8x128xf32> to vector<1xf32>
    %133 = vector.shape_cast %132 : vector<1xf32> to vector<1x1x1xf32>
    %134 = vector.extract %133[0, 0, 0] : f32 from vector<1x1x1xf32>
    %135 = arith.mulf %130, %130 : vector<8x128xf32>
    %136 = vector.shape_cast %135 : vector<8x128xf32> to vector<1x8x128xf32>
    %cst_40 = arith.constant dense<0.000000e+00> : vector<1xf32>
    %137 = vector.multi_reduction <add>, %136, %cst_40 [1, 2] : vector<1x8x128xf32> to vector<1xf32>
    %138 = vector.shape_cast %137 : vector<1xf32> to vector<1x1x1xf32>
    %139 = vector.extract %138[0, 0, 0] : f32 from vector<1x1x1xf32>
    %140 = arith.divf %134, %37 : f32
    %141 = arith.divf %139, %37 : f32
    %142 = arith.mulf %140, %140 : f32
    %143 = arith.subf %141, %142 : f32
    %cst_41 = arith.constant 0.000000e+00 : f32
    %144 = arith.maximumf %143, %cst_41 : f32
    %cst_42 = arith.constant 9.99999974E-6 : f32
    %145 = arith.addf %144, %cst_42 : f32
    %146 = math.rsqrt %145 : f32
    %147 = vector.broadcast %140 : f32 to vector<1x256xf32>
    %148 = arith.mulf %28, %147 : vector<1x256xf32>
    %149 = arith.addf %128, %148 : vector<1x256xf32>
    %150 = vector.broadcast %146 : f32 to vector<1x256xf32>
    %151 = arith.mulf %28, %150 : vector<1x256xf32>
    %152 = arith.addf %129, %151 : vector<1x256xf32>
    %153 = vector.extract_strided_slice %127 {offsets = [0, 128], sizes = [8, 128], strides = [1, 1]} : vector<8x256xf32> to vector<8x128xf32>
    %154 = vector.shape_cast %153 : vector<8x128xf32> to vector<1x8x128xf32>
    %cst_43 = arith.constant dense<0.000000e+00> : vector<1xf32>
    %155 = vector.multi_reduction <add>, %154, %cst_43 [1, 2] : vector<1x8x128xf32> to vector<1xf32>
    %156 = vector.shape_cast %155 : vector<1xf32> to vector<1x1x1xf32>
    %157 = vector.extract %156[0, 0, 0] : f32 from vector<1x1x1xf32>
    %158 = arith.mulf %153, %153 : vector<8x128xf32>
    %159 = vector.shape_cast %158 : vector<8x128xf32> to vector<1x8x128xf32>
    %cst_44 = arith.constant dense<0.000000e+00> : vector<1xf32>
    %160 = vector.multi_reduction <add>, %159, %cst_44 [1, 2] : vector<1x8x128xf32> to vector<1xf32>
    %161 = vector.shape_cast %160 : vector<1xf32> to vector<1x1x1xf32>
    %162 = vector.extract %161[0, 0, 0] : f32 from vector<1x1x1xf32>
    %163 = arith.divf %157, %57 : f32
    %164 = arith.divf %162, %57 : f32
    %165 = arith.mulf %163, %163 : f32
    %166 = arith.subf %164, %165 : f32
    %cst_45 = arith.constant 0.000000e+00 : f32
    %167 = arith.maximumf %166, %cst_45 : f32
    %cst_46 = arith.constant 9.99999974E-6 : f32
    %168 = arith.addf %167, %cst_46 : f32
    %169 = math.rsqrt %168 : f32
    %170 = vector.broadcast %163 : f32 to vector<1x256xf32>
    %171 = arith.mulf %48, %170 : vector<1x256xf32>
    %172 = arith.addf %149, %171 : vector<1x256xf32>
    %173 = vector.broadcast %169 : f32 to vector<1x256xf32>
    %174 = arith.mulf %48, %173 : vector<1x256xf32>
    %175 = arith.addf %152, %174 : vector<1x256xf32>
    %176 = vector.broadcast %172 : vector<1x256xf32> to vector<8x256xf32>
    %177 = arith.mulf %176, %97 : vector<8x256xf32>
    %178 = arith.subf %127, %177 : vector<8x256xf32>
    %179 = vector.broadcast %175 : vector<1x256xf32> to vector<8x256xf32>
    %180 = arith.mulf %178, %179 : vector<8x256xf32>
    %cst_47 = arith.constant 1.000000e-01 : f32
    %181 = vector.broadcast %cst_47 : f32 to vector<8x256xf32>
    %182 = arith.mulf %181, %180 : vector<8x256xf32>
    %183 = arith.maximumf %180, %182 : vector<8x256xf32>
    %cst_48 = arith.constant 1.09861231 : f32
    %184 = vector.broadcast %cst_48 : f32 to vector<1x256xf32>
    %185 = arith.mulf %184, %54 : vector<1x256xf32>
    %186 = vector.broadcast %94 : vector<8x1xf32> to vector<8x256xf32>
    %187 = vector.broadcast %185 : vector<1x256xf32> to vector<8x256xf32>
    %188 = arith.mulf %186, %187 : vector<8x256xf32>
    %189 = arith.addf %183, %188 : vector<8x256xf32>
    %c2_i32_49 = arith.constant 2 : i32
    %190 = tpu.dynamic_rotate %189 by %c2_i32_49 dim 1 : vector<8x256xf32>, i32 -> vector<8x256xf32>
    %191 = vector.broadcast %64 : vector<1x256xf32> to vector<8x256xf32>
    %192 = arith.mulf %190, %191 : vector<8x256xf32>
    %c0_50 = arith.constant 0 : index
    %c0_51 = arith.constant 0 : index
    %193 = vector.load %arg8[%c0_50, %c0_51] : memref<40x256xf32, #tpu.memory_space<vmem>>, vector<8x256xf32>
    tpu.vector_store %arg8[%c0_50, %c0_51], %192 {strides = array<i32>} : memref<40x256xf32, #tpu.memory_space<vmem>>, vector<8x256xf32>,
    %c1_i32_52 = arith.constant 1 : i32
    %194 = tpu.dynamic_rotate %189 by %c1_i32_52 dim 1 : vector<8x256xf32>, i32 -> vector<8x256xf32>
    %195 = vector.broadcast %71 : vector<1x256xf32> to vector<8x256xf32>
    %196 = arith.mulf %194, %195 : vector<8x256xf32>
    %c8_53 = arith.constant 8 : index
    %c0_54 = arith.constant 0 : index
    %197 = vector.load %arg8[%c8_53, %c0_54] : memref<40x256xf32, #tpu.memory_space<vmem>>, vector<8x256xf32>
    tpu.vector_store %arg8[%c8_53, %c0_54], %196 {strides = array<i32>} : memref<40x256xf32, #tpu.memory_space<vmem>>, vector<8x256xf32>,
    %c16_55 = arith.constant 16 : index
    %c0_56 = arith.constant 0 : index
    %198 = vector.load %arg8[%c16_55, %c0_56] : memref<40x256xf32, #tpu.memory_space<vmem>>, vector<8x256xf32>
    tpu.vector_store %arg8[%c16_55, %c0_56], %189 {strides = array<i32>} : memref<40x256xf32, #tpu.memory_space<vmem>>, vector<8x256xf32>,
    %c255_i32_57 = arith.constant 255 : i32
    %199 = tpu.dynamic_rotate %189 by %c255_i32_57 dim 1 : vector<8x256xf32>, i32 -> vector<8x256xf32>
    %200 = vector.broadcast %78 : vector<1x256xf32> to vector<8x256xf32>
    %201 = arith.mulf %199, %200 : vector<8x256xf32>
    %c24_58 = arith.constant 24 : index
    %c0_59 = arith.constant 0 : index
    %202 = vector.load %arg8[%c24_58, %c0_59] : memref<40x256xf32, #tpu.memory_space<vmem>>, vector<8x256xf32>
    tpu.vector_store %arg8[%c24_58, %c0_59], %201 {strides = array<i32>} : memref<40x256xf32, #tpu.memory_space<vmem>>, vector<8x256xf32>,
    %c254_i32_60 = arith.constant 254 : i32
    %203 = tpu.dynamic_rotate %189 by %c254_i32_60 dim 1 : vector<8x256xf32>, i32 -> vector<8x256xf32>
    %204 = vector.broadcast %85 : vector<1x256xf32> to vector<8x256xf32>
    %205 = arith.mulf %203, %204 : vector<8x256xf32>
    %c32_61 = arith.constant 32 : index
    %c0_62 = arith.constant 0 : index
    %206 = vector.load %arg8[%c32_61, %c0_62] : memref<40x256xf32, #tpu.memory_space<vmem>>, vector<8x256xf32>
    tpu.vector_store %arg8[%c32_61, %c0_62], %205 {strides = array<i32>} : memref<40x256xf32, #tpu.memory_space<vmem>>, vector<8x256xf32>,
    %c0_63 = arith.constant 0 : index
    %c0_64 = arith.constant 0 : index
    %207 = vector.load %arg5[%c0_63, %c0_64] : memref<8x40xf32, #tpu.memory_space<vmem>>, vector<8x40xf32>
    %c0_65 = arith.constant 0 : index
    %c0_66 = arith.constant 0 : index
    %208 = vector.load %arg8[%c0_65, %c0_66] : memref<40x256xf32, #tpu.memory_space<vmem>>, vector<40x256xf32>
    %cst_67 = arith.constant dense<0.000000e+00> : vector<8x256xf32>
    %209 = tpu.matmul %207, %208, %cst_67 {dimension_numbers = #tpu.dot_dimension_numbers<[1], [0], [0], [1], [0, 0, 1, 1], [], []>} : vector<8x40xf32>, vector<40x256xf32>, vector<8x256xf32> -> vector<8x256xf32>
    %c0_68 = arith.constant 0 : index
    %c0_69 = arith.constant 0 : index
    %210 = vector.load %arg6[%c0_68, %c0_69] : memref<8x1xf32, #tpu.memory_space<vmem>>, vector<8x1xf32>
    %211 = vector.broadcast %210 : vector<8x1xf32> to vector<8x256xf32>
    %212 = arith.addf %209, %211 : vector<8x256xf32>
    %213 = arith.mulf %212, %97 : vector<8x256xf32>
    %cst_70 = arith.constant 0.000000e+00 : f32
    %214 = vector.broadcast %cst_70 : f32 to vector<1x256xf32>
    %cst_71 = arith.constant 0.000000e+00 : f32
    %215 = vector.broadcast %cst_71 : f32 to vector<1x256xf32>
    %216 = vector.extract_strided_slice %213 {offsets = [0, 0], sizes = [8, 128], strides = [1, 1]} : vector<8x256xf32> to vector<8x128xf32>
    %217 = vector.shape_cast %216 : vector<8x128xf32> to vector<1x8x128xf32>
    %cst_72 = arith.constant dense<0.000000e+00> : vector<1xf32>
    %218 = vector.multi_reduction <add>, %217, %cst_72 [1, 2] : vector<1x8x128xf32> to vector<1xf32>
    %219 = vector.shape_cast %218 : vector<1xf32> to vector<1x1x1xf32>
    %220 = vector.extract %219[0, 0, 0] : f32 from vector<1x1x1xf32>
    %221 = arith.mulf %216, %216 : vector<8x128xf32>
    %222 = vector.shape_cast %221 : vector<8x128xf32> to vector<1x8x128xf32>
    %cst_73 = arith.constant dense<0.000000e+00> : vector<1xf32>
    %223 = vector.multi_reduction <add>, %222, %cst_73 [1, 2] : vector<1x8x128xf32> to vector<1xf32>
    %224 = vector.shape_cast %223 : vector<1xf32> to vector<1x1x1xf32>
    %225 = vector.extract %224[0, 0, 0] : f32 from vector<1x1x1xf32>
    %226 = arith.divf %220, %37 : f32
    %227 = arith.divf %225, %37 : f32
    %228 = arith.mulf %226, %226 : f32
    %229 = arith.subf %227, %228 : f32
    %cst_74 = arith.constant 0.000000e+00 : f32
    %230 = arith.maximumf %229, %cst_74 : f32
    %cst_75 = arith.constant 9.99999974E-6 : f32
    %231 = arith.addf %230, %cst_75 : f32
    %232 = math.rsqrt %231 : f32
    %233 = vector.broadcast %226 : f32 to vector<1x256xf32>
    %234 = arith.mulf %28, %233 : vector<1x256xf32>
    %235 = arith.addf %214, %234 : vector<1x256xf32>
    %236 = vector.broadcast %232 : f32 to vector<1x256xf32>
    %237 = arith.mulf %28, %236 : vector<1x256xf32>
    %238 = arith.addf %215, %237 : vector<1x256xf32>
    %239 = vector.extract_strided_slice %213 {offsets = [0, 128], sizes = [8, 128], strides = [1, 1]} : vector<8x256xf32> to vector<8x128xf32>
    %240 = vector.shape_cast %239 : vector<8x128xf32> to vector<1x8x128xf32>
    %cst_76 = arith.constant dense<0.000000e+00> : vector<1xf32>
    %241 = vector.multi_reduction <add>, %240, %cst_76 [1, 2] : vector<1x8x128xf32> to vector<1xf32>
    %242 = vector.shape_cast %241 : vector<1xf32> to vector<1x1x1xf32>
    %243 = vector.extract %242[0, 0, 0] : f32 from vector<1x1x1xf32>
    %244 = arith.mulf %239, %239 : vector<8x128xf32>
    %245 = vector.shape_cast %244 : vector<8x128xf32> to vector<1x8x128xf32>
    %cst_77 = arith.constant dense<0.000000e+00> : vector<1xf32>
    %246 = vector.multi_reduction <add>, %245, %cst_77 [1, 2] : vector<1x8x128xf32> to vector<1xf32>
    %247 = vector.shape_cast %246 : vector<1xf32> to vector<1x1x1xf32>
    %248 = vector.extract %247[0, 0, 0] : f32 from vector<1x1x1xf32>
    %249 = arith.divf %243, %57 : f32
    %250 = arith.divf %248, %57 : f32
    %251 = arith.mulf %249, %249 : f32
    %252 = arith.subf %250, %251 : f32
    %cst_78 = arith.constant 0.000000e+00 : f32
    %253 = arith.maximumf %252, %cst_78 : f32
    %cst_79 = arith.constant 9.99999974E-6 : f32
    %254 = arith.addf %253, %cst_79 : f32
    %255 = math.rsqrt %254 : f32
    %256 = vector.broadcast %249 : f32 to vector<1x256xf32>
    %257 = arith.mulf %48, %256 : vector<1x256xf32>
    %258 = arith.addf %235, %257 : vector<1x256xf32>
    %259 = vector.broadcast %255 : f32 to vector<1x256xf32>
    %260 = arith.mulf %48, %259 : vector<1x256xf32>
    %261 = arith.addf %238, %260 : vector<1x256xf32>
    %262 = vector.broadcast %258 : vector<1x256xf32> to vector<8x256xf32>
    %263 = arith.mulf %262, %97 : vector<8x256xf32>
    %264 = arith.subf %213, %263 : vector<8x256xf32>
    %265 = vector.broadcast %261 : vector<1x256xf32> to vector<8x256xf32>
    %266 = arith.mulf %264, %265 : vector<8x256xf32>
    %cst_80 = arith.constant 1.000000e-01 : f32
    %267 = vector.broadcast %cst_80 : f32 to vector<8x256xf32>
    %268 = arith.mulf %267, %266 : vector<8x256xf32>
    %269 = arith.maximumf %266, %268 : vector<8x256xf32>
    %270 = arith.addf %125, %269 : vector<8x256xf32>
    %c0_81 = arith.constant 0 : index
    %c0_82 = arith.constant 0 : index
    %c0_83 = arith.constant 0 : index
    %271 = vector.load %arg7[%c0_81, %c0_82, %c0_83] : memref<1x8x256xf32, #tpu.memory_space<vmem>>, vector<1x8x256xf32>
    %272 = vector.shape_cast %271 : vector<1x8x256xf32> to vector<8x256xf32>
    %273 = vector.shape_cast %270 : vector<8x256xf32> to vector<1x8x256xf32>
    tpu.vector_store %arg7[%c0_81, %c0_82, %c0_83], %273 {strides = array<i32>} : memref<1x8x256xf32, #tpu.memory_space<vmem>>, vector<1x8x256xf32>,
    return
  }
  func.func @transform_0(%arg0: i32, %arg1: memref<2xi32, #tpu.memory_space<smem>>) -> (i32, i32, i32) {
    %c0_i32 = arith.constant 0 : i32
    %c0_i32_0 = arith.constant 0 : i32
    %c0_i32_1 = arith.constant 0 : i32
    return %arg0, %c0_i32, %c0_i32_0 : i32, i32, i32
  }
  func.func @transform_1(%arg0: i32, %arg1: memref<2xi32, #tpu.memory_space<smem>>) -> (i32, i32) {
    %c0_i32 = arith.constant 0 : i32
    %c0_i32_0 = arith.constant 0 : i32
    %c0_i32_1 = arith.constant 0 : i32
    return %c0_i32, %c0_i32_0 : i32, i32
  }
  func.func @transform_2(%arg0: i32, %arg1: memref<2xi32, #tpu.memory_space<smem>>) -> (i32, i32) {
    %c0_i32 = arith.constant 0 : i32
    %c0_i32_0 = arith.constant 0 : i32
    %c0_i32_1 = arith.constant 0 : i32
    return %c0_i32, %c0_i32_0 : i32, i32
  }
  func.func @transform_3(%arg0: i32, %arg1: memref<2xi32, #tpu.memory_space<smem>>) -> (i32, i32) {
    %c0_i32 = arith.constant 0 : i32
    %c0_i32_0 = arith.constant 0 : i32
    %c0_i32_1 = arith.constant 0 : i32
    return %c0_i32, %c0_i32_0 : i32, i32
  }
  func.func @transform_4(%arg0: i32, %arg1: memref<2xi32, #tpu.memory_space<smem>>) -> (i32, i32) {
    %c0_i32 = arith.constant 0 : i32
    %c0_i32_0 = arith.constant 0 : i32
    %c0_i32_1 = arith.constant 0 : i32
    return %c0_i32, %c0_i32_0 : i32, i32
  }
  func.func @transform_5(%arg0: i32, %arg1: memref<2xi32, #tpu.memory_space<smem>>) -> (i32, i32, i32) {
    %c0_i32 = arith.constant 0 : i32
    %c0_i32_0 = arith.constant 0 : i32
    %c0_i32_1 = arith.constant 0 : i32
    return %arg0, %c0_i32, %c0_i32_0 : i32, i32, i32
  }
}

</mosaic_0001>

<bundles_post_ra>
// kernel: tpu_custom_call.1
= control target key start
LH: loop header
LB: loop body
LE: loop exit
PB: predicated region body
PF: predicated region fallthrough
CT: control target
= control target key end

     0   :  { %s912_s24 = smov [#allocation4]   ;;  %s1216_s0 = inlined_call_operand.vmem [shape: s32[2], index: 0, kind: input, shape index: {}]   ;;  %s1217_s1 = inlined_call_operand.vmem [shape: f32[1,8,256], index: 1, kind: input, shape index: {}]   ;;  %s1218_s2 = inlined_call_operand.hbm [shape: f32[16,40], index: 2, kind: input, shape index: {}]   ;;  %s1219_s3 = inlined_call_operand.vmem [shape: f32[16,1], index: 3, kind: input, shape index: {}]   ;;  %s1220_s4 = inlined_call_operand.vmem [shape: f32[8,40], index: 4, kind: input, shape index: {}]   ;;  %s1221_s5 = inlined_call_operand.vmem [shape: f32[8,1], index: 5, kind: input, shape index: {}]   ;;  %s1222_s6 = inlined_call_operand.hbm [shape: f32[1,8,256], index: 6, kind: output, shape index: {}]  }
   0x1   :  { %s12_s23 = sshll.u32 %s1216_s0, 4  ;;  %s13_s23 = int_to_ptr.vmem [resolvable:$true] %s12_s23 }
   0x2   :  { %15 = dma.vmem_to_smem %s13_s23, 16, %s912_s24, [#allocation3] }
   0x3   :  { %906 = dma.done.wait [#allocation3], 16 }
   0x4   :  { %907 = vsyncadd [#allocation3], 4294967280 }
   0x5   :  { %18 = sfence }
   0x6   :  { %19 = vsyncpa [#allocation6], 0 }
   0x7   :  { %20 = vsyncpa [#allocation7], 0  ;;  %s27_s27 = sshll.u32 %s1218_s2, 4  ;;  %s913_s28 = smov [#allocation5]   ;;  %s28_s27 = int_to_ptr.hbm [resolvable:$true] %s27_s27 }
   0x8   :  { %s29_s29 = sshll.u32 %s913_s28, 4  ;;  %s914_s30 = smov 128   ;;  %s30_s29 = int_to_ptr.vmem [resolvable:$true] %s29_s29 }
   0x9   :  { %s915_s7 = smov 8  }
   0xa   :  { %35 = dma.hbm_to_vmem [thread:$0]  %s28_s27, 256, %s30_s29, [#allocation6], %s914_s30, %s914_s30, %s915_s7  }
   0xb   :  { %908 = dma.done.wait [#allocation6], 256  }
   0xc   :  { %909 = vsyncadd [#allocation6], 4294967040  ;;  %v46_v0 = vlaneseq  ;;  %s966_s0 = sld [smem:[#allocation4]]  ;;  %v916_v6 = vmov 0.0   ;;  %v171_v11 = vld [vmem:[%s1217_s1] sm:$0xff]  ;;  %s917_s10 = smov 127  }
   0xd   :  { %s971_s8 = sld [smem:[#allocation4 + $0x1]]  ;;  %s918_s11 = smov 126   ;;  %v172_v17 = vld [vmem:[%s1217_s1 + $0x8] sm:$0xff]  ;;  %v921_v20 = vmov 0   ;;  %v221_v53 = vld [vmem:[#allocation5] sm:$0xff]  ;;  %vm245_vm14 = vcmask 326656  }
   0xe   :  { %v969_v1 = vand.u32 127, %v46_v0  ;;  %s919_s14 = smov 1   ;;  %s920_s15 = smov 2   ;;  %v234_v19 = vld [vmem:[%s1219_s3 + $0x8] sm:$0xff]  ;;  %831 = vset.pattern.permute.xlu2 %v921_v20  ;;  %832 = vset.pattern.permute.xlu0 %v921_v20  ;;  %v1076_v55 = vshrl.u32 %v46_v0, 7 }
   0xf   :  { %833 = vset.pattern.permute.xlu1 %v921_v20  ;;  %v222_v54 = vld [vmem:[#allocation5 + $0x8] sm:$0xff]  ;;  %s922_s19 = smov 1.0   ;;  %s923_s7 = smov 0.0  }
  0x10   :  { %v48_v2 = vadd.s32 128, %v969_v1  ;;  %vm153_vm4 = vcmp.lt.s32.totalorder %v969_v1, 126  ;;  %vm145_vm6 = vcmp.lt.s32.totalorder %v969_v1, 127  ;;  %vm190_vm8 = vcmp.lt.s32.totalorder %v969_v1, 1 }
  0x11   :  { %v1016_v24 = vsel %vm153_vm4, 1.0, %v916_v6  ;;  %v1025_v28 = vsel %vm145_vm6, 1.0, %v916_v6  ;;  %vm135_vm9 = vcmp.ge.s32.totalorder %v969_v1, 1  ;;  %vm125_vm11 = vcmp.ge.s32.totalorder %v969_v1, 2 }
  0x12   :  { %v974_v3 = vand.u32 127, %v48_v2  ;;  %v85_v4 = vstv %s966_s0  ;;  %v1051_v41 = vsel %vm135_vm9, 1.0, %v916_v6  ;;  %vm179_vm13 = vcmp.lt.s32.totalorder %v969_v1, 2  ;;  %s769_s1 = sshll.u32 %s966_s0, 2 }
  0x13   :  { %vm86_vm0 = vcmp.lt.s32.totalorder %v969_v1, %v85_v4  ;;  %v111_v5 = vstv %s971_s8  ;;  %v1058_v43 = vsel %vm125_vm11, 1.0, %v916_v6  ;;  %vm163_vm15 = vcmp.lt.s32.totalorder %v1076_v55, 4  ;;  %s97_s18 = scvt.s32.f32 %s769_s1  ;;  %s773_s21 = sshll.u32 %s971_s8, 2 }
  0x14   :  { %vm87_vm1 = vcmp.lt.s32.totalorder %v974_v3, %v85_v4  ;;  %vm112_vm2 = vcmp.lt.s32.totalorder %v969_v1, %v111_v5  ;;  %v767_v7 = vsel %vm86_vm0, 1.0, %v916_v6  ;;  %vm113_vm3 = vcmp.lt.s32.totalorder %v974_v3, %v111_v5  ;;  %s123_s22 = scvt.s32.f32 %s773_s21 }
  0x15   :  { %v771_v8 = vsel %vm112_vm2, 1.0, %v916_v6  ;;  %v768_v9 = vsel %vm87_vm1, 1.0, %v916_v6  ;;  %v772_v14 = vsel %vm113_vm3, 1.0, %v916_v6  ;;  %vm154_vm5 = vcmp.lt.s32.totalorder %v974_v3, 126  ;;  %s98_s20 = smax.f32 %s922_s19, %s97_s18 }
  0x16   :  { %v118_v10 = vmul.f32 0.0, %v771_v8  ;;  %v93_v13 = vmul.f32 0.0, %v768_v9  ;;  %vm146_vm7 = vcmp.lt.s32.totalorder %v974_v3, 127  ;;  %v1019_v25 = vsel %vm154_vm5, 1.0, %v916_v6  ;;  %s124_s23 = smax.f32 %s922_s19, %s123_s22 }
  0x17   :  { %v1028_v29 = vsel %vm146_vm7, 1.0, %v916_v6  ;;  %vm136_vm10 = vcmp.ge.s32.totalorder %v974_v3, 1  ;;  %vm126_vm12 = vcmp.ge.s32.totalorder %v974_v3, 2  ;;  %v782_v58 = vsel %vm163_vm15, 1.0, %v916_v6 }
  0x18   :  { %v988_v12 = vadd.f32 %v767_v7, %v118_v10  ;;  %v994_v16 = vadd.f32 %v772_v14, %v93_v13  ;;  %v1054_v42 = vsel %vm136_vm10, 1.0, %v916_v6  ;;  %v1061_v44 = vsel %vm126_vm12, 1.0, %v916_v6 }
  0x19   :  { %v319_v8 = vstv %s98_s20 }
  0x1a   :  { %v173_v15 = vmul.f32 %v171_v11, %v988_v12  ;;  %v174_v18 = vmul.f32 %v172_v17, %v994_v16  ;;  %v1085_v60 = vmul.f32 %v782_v58, %v988_v12  ;;  %v1088_v61 = vmul.f32 %v782_v58, %v994_v16 }
  0x1b   :  { %834 = vrcp.f32 %v319_v8  ;;  %vm325_vm0 = vweird.f32 %v319_v8 }
  0x1c   :  { %199 = vrot.lane.b32.xlu1 %v173_v15, %s917_s10  ;;  %210 = vrot.lane.b32.xlu0 %v173_v15, %s918_s11 }
  0x1d   :  { %186 = vrot.lane.b32.xlu2 %v173_v15, %s919_s14 }
  0x21   :  { %v835_v9 = vpop.eup %834 }
  0x22   :  { %v321_v10 = vmul.f32 %v835_v9, %v319_v8  ;;  %vm326_vm1 = vweird.f32 %v835_v9 }
  0x23   :  { %vm327_vm2 = vmor %vm325_vm0, %vm326_vm1 }
  0x24   :  { %201 = vrot.lane.b32.xlu1 %v174_v18, %s917_s10  ;;  %212 = vrot.lane.b32.xlu0 %v174_v18, %s918_s11  ;;  %v322_v11 = vsub.f32 1.0, %v321_v10 }
  0x25   :  { %188 = vrot.lane.b32.xlu2 %v174_v18, %s919_s14 }
  0x26   :  { %v323_v17 = vmul.f32 %v835_v9, %v322_v11 }
  0x2c   :  { %177 = vrot.lane.b32.xlu1 %v174_v18, %s920_s15  ;;  %175 = vrot.lane.b32.xlu0 %v173_v15, %s920_s15 }
  0x2d   :  { %242 = vperm.xlu2 %831, %v234_v19  }
  0x77   :  { %v187_v21 = vpop.permute.xlu2 %186 }
  0x7f   :  { %v189_v34 = vpop.permute.xlu2 %188 }
  0x80   :  { %v191_v39 = vsel %vm190_vm8, %v187_v21, %v189_v34  ;;  %v192_v40 = vsel %vm190_vm8, %v189_v34, %v187_v21 }
  0x81   :  { %v193_v47 = vmul.f32 %v1051_v41, %v192_v40  ;;  %v194_v48 = vmul.f32 %v1054_v42, %v191_v39  ;;  %v398_v40 = vstv %s124_s23 }
  0x82   :  { %836 = vrcp.f32 %v398_v40  ;;  %vm404_vm5 = vweird.f32 %v398_v40  ;;  %v408_v10 = vand.u32 2147483647, %v398_v40 }
  0x84   :  { %vm409_vm12 = vcmp.eq.f32.partialorder %v408_v10, 8.507059e+37 }
  0x87   :  { %v243_v59 = vpop.permute.xlu2 %242 }
  0x8e   :  { %v200_v22 = vpop.permute.xlu1 %199  ;;  %v211_v23 = vpop.permute.xlu0 %210 }
  0x96   :  { %v202_v26 = vpop.permute.xlu1 %201  ;;  %v213_v27 = vpop.permute.xlu0 %212 }
  0x97   :  { %v204_v30 = vsel %vm145_vm6, %v200_v22, %v202_v26  ;;  %v205_v31 = vsel %vm145_vm6, %v202_v26, %v200_v22  ;;  %v215_v32 = vsel %vm153_vm4, %v211_v23, %v213_v27  ;;  %v216_v33 = vsel %vm153_vm4, %v213_v27, %v211_v23 }
  0x98   :  { %v217_v35 = vmul.f32 %v1016_v24, %v215_v32  ;;  %v218_v36 = vmul.f32 %v1019_v25, %v216_v33  ;;  %v206_v37 = vmul.f32 %v1025_v28, %v204_v30  ;;  %v207_v38 = vmul.f32 %v1028_v29, %v205_v31 }
  0x99   :  { %v331_v22 = vand.u32 2147483648, %v319_v8  ;;  %v324_v23 = vadd.f32 %v835_v9, %v323_v17  ;;  %v329_v26 = vand.u32 2147483647, %v319_v8 }
  0x9a   :  { %263 = vmatpush.msra.mxu0 %v217_v35  ;;  %286 = vmatpush.msra.mxu1 %v218_v36 }
  0x9b   :  { %v332_v33 = vor.u32 1.1754944e-38, %v331_v22  ;;  %v328_v34 = vsel %vm327_vm2, %v835_v9, %v324_v23  ;;  %vm330_vm3 = vcmp.eq.f32.partialorder %v329_v26, 8.507059e+37 }
  0x9c   :  { %264 = vmatpush.msra.mxu0 %v206_v37  ;;  %287 = vmatpush.msra.mxu1 %v207_v38 }
  0x9d   :  { %v333_v38 = vsel %vm330_vm3, %v332_v33, %v328_v34  ;;  %vm166_vm3 = vcmp.eq.s32.totalorder %v1076_v55, 4 }
  0x9e   :  { %v178_v45 = vpop.permute.xlu1 %177  ;;  %265 = vmatpush.msra.mxu0 %v173_v15  ;;  %288 = vmatpush.msra.mxu1 %v174_v18  ;;  %v176_v46 = vpop.permute.xlu0 %175 }
  0x9f   :  { %v180_v49 = vsel %vm179_vm13, %v176_v46, %v178_v45  ;;  %v181_v50 = vsel %vm179_vm13, %v178_v45, %v176_v46  ;;  %v837_v46 = vpop.eup %836 }
  0xa0   :  { %266 = vmatpush.msra.mxu0 %v193_v47  ;;  %289 = vmatpush.msra.mxu1 %v194_v48  ;;  %v182_v51 = vmul.f32 %v1058_v43, %v181_v50  ;;  %v183_v52 = vmul.f32 %v1061_v44, %v180_v49  ;;  %v400_v50 = vmul.f32 %v837_v46, %v398_v40  ;;  %vm405_vm7 = vweird.f32 %v837_v46 }
  0xa1   :  { %vm1115_vm9 = vmor %vm404_vm5, %vm405_vm7 }
  0xa2   :  { %267 = vmatpush.msra.mxu0 %v182_v51  ;;  %290 = vmatpush.msra.mxu1 %v183_v52 }
  0xa3   :  { %784 = vmatmul.msk.f32.vlgmr.msra.gmra.mxu0 %vm245_vm14, %v221_v53  ;;  %786 = vmatmul.msk.f32.vlgmr.msra.gmra.mxu1 %vm245_vm14, %v221_v53  ;;  %v401_v53 = vsub.f32 1.0, %v400_v50 }
  0xab   :  { %785 = vmatmul.msk.f32.gmra.mxu0 %vm245_vm14, %v222_v54  ;;  %787 = vmatmul.msk.f32.gmra.mxu1 %vm245_vm14, %v222_v54 }
 0x120   :  { %v1078_v56 = vpop.f32.mrf.mxu0  ;;  %v1080_v57 = vpop.f32.mrf.mxu1 }
 0x128   :  { %v272_v62 = vpop.f32.mrf.mxu0  ;;  %v295_v63 = vpop.f32.mrf.mxu1 }
 0x129   :  { %v273_v0 = vadd.f32 %v272_v62, %v243_v59  ;;  %v296_v2 = vadd.f32 %v295_v63, %v243_v59  ;;  %v402_v63 = vmul.f32 %v837_v46, %v401_v53 }
 0x12b   :  { %v1091_v3 = vmul.f32 %v273_v0, %v1085_v60  ;;  %v1094_v4 = vmul.f32 %v296_v2, %v1088_v61  ;;  %v403_v9 = vadd.f32 %v837_v46, %v402_v63 }
 0x12d   :  { %379 = vadd.xlane.f32.xlu2 %v1094_v4  ;;  %300 = vadd.xlane.f32.xlu0 %v1091_v3  ;;  %v309_v5 = vmul.f32 %v1091_v3, %v1091_v3  ;;  %v388_v7 = vmul.f32 %v1094_v4, %v1094_v4 }
 0x12f   :  { %310 = vadd.xlane.f32.xlu1 %v309_v5 }
 0x135   :  { %389 = vadd.xlane.f32.xlu2 %v388_v7  ;;  %v410_v7 = vand.u32 2147483648, %v398_v40 }
 0x137   :  { %v411_v17 = vor.u32 1.1754944e-38, %v410_v7 }
 0x1a0   :  { %v301_v13 = vpop.xlane.xlu0 %300  ;;  %v380_v39 = vpop.xlane.xlu2 %379 }
 0x1a1   :  { %v302_v14 = vrot.slane %v301_v13, 4  ;;  %v381_v47 = vrot.slane %v380_v39, 4 }
 0x1a2   :  { %v311_v15 = vpop.xlane.xlu1 %310 }
 0x1a3   :  { %v303_v18 = vadd.f32 %v302_v14, %v301_v13  ;;  %v312_v19 = vrot.slane %v311_v15, 4  ;;  %v382_v51 = vadd.f32 %v381_v47, %v380_v39 }
 0x1a5   :  { %v304_v20 = vrot.slane %v303_v18, 2  ;;  %v313_v21 = vadd.f32 %v312_v19, %v311_v15  ;;  %v383_v54 = vrot.slane %v382_v51, 2  ;;  %v407_v19 = vsel %vm1115_vm9, %v837_v46, %v403_v9 }
 0x1a6   :  { %v412_v23 = vsel %vm409_vm12, %v411_v17, %v407_v19 }
 0x1a7   :  { %v314_v27 = vrot.slane %v313_v21, 2  ;;  %v305_v30 = vadd.f32 %v304_v20, %v303_v18  ;;  %v384_v2 = vadd.f32 %v383_v54, %v382_v51  ;;  %v469_v54 = vmul.f32 1.0986123, %v994_v16 }
 0x1a8   :  { %v390_v45 = vpop.xlane.xlu2 %389 }
 0x1a9   :  { %v306_v31 = vrot.slane %v305_v30, 1  ;;  %v315_v32 = vadd.f32 %v314_v27, %v313_v21  ;;  %v391_v48 = vrot.slane %v390_v45, 4  ;;  %v385_v14 = vrot.slane %v384_v2, 1 }
 0x1ab   :  { %v307_v35 = vadd.f32 %v306_v31, %v305_v30  ;;  %v316_v36 = vrot.slane %v315_v32, 1  ;;  %v392_v52 = vadd.f32 %v391_v48, %v390_v45  ;;  %v386_v21 = vadd.f32 %v385_v14, %v384_v2 }
 0x1ad   :  { %790 = vpush %v307_v35  ;;  %v317_v37 = vadd.f32 %v316_v36, %v315_v32  ;;  %v393_v59 = vrot.slane %v392_v52, 2 }
 0x1af   :  { %792 = vpush %v317_v37  ;;  %v394_v5 = vadd.f32 %v393_v59, %v392_v52 }
 0x1b0   :  { %794 = vpush %v333_v38 }
 0x1b1   :  { %v395_v15 = vrot.slane %v394_v5, 1 }
 0x1b3   :  { %v396_v22 = vadd.f32 %v395_v15, %v394_v5 }
 0x1de   :  { %s791_s24 = spop %790 }
 0x1e0   :  { %s793_s25 = spop %792 }
 0x1e1   :  { %s1106_s26 = spop %794 }
 0x1e2   :  { %s1109_s27 = smul.f32 %s1106_s26, %s791_s24 }
 0x1e3   :  { %s352_s28 = smul.f32 %s1106_s26, %s793_s25 }
 0x1e4   :  { %s353_s29 = smul.f32 %s1109_s27, %s1109_s27  ;;  %v369_v26 = vstv %s1109_s27 }
 0x1e5   :  { %v371_v27 = vmul.f32 0.0, %v369_v26 }
 0x1e6   :  { %s354_s30 = ssub.f32 %s352_s28, %s353_s29 }
 0x1e8   :  { %s355_s0 = smax.f32 %s923_s7, %s354_s30 }
 0x1e9   :  { %s356_s8 = sadd.f32 1e-05, %s355_s0 }
 0x1eb   :  { %v357_v49 = vstv %s356_s8 }
 0x1ec   :  { %838 = vrsqrt.f32 %v357_v49  ;;  %vm364_vm11 = vweird.f32 %v357_v49 }
 0x1f2   :  { %v839_v58 = vpop.eup %838 }
 0x1f3   :  { %v359_v62 = vmul.f32 %v839_v58, %v357_v49  ;;  %vm365_vm10 = vweird.f32 %v839_v58 }
 0x1f4   :  { %vm366_vm15 = vmor %vm364_vm11, %vm365_vm10 }
 0x1f5   :  { %v360_v0 = vmul.f32 %v839_v58, %v359_v62 }
 0x1f7   :  { %v361_v8 = vmul.f32 0.5, %v360_v0  ;;  %v468_v0 = vmul.f32 1.0986123, %v988_v12 }
 0x1f9   :  { %v362_v13 = vsub.f32 1.5, %v361_v8 }
 0x1fb   :  { %v363_v18 = vmul.f32 %v839_v58, %v362_v13 }
 0x1fd   :  { %v367_v20 = vsel %vm366_vm15, %v839_v58, %v363_v18  ;;  %v783_v58 = vsel %vm166_vm3, 1.0, %v916_v6  ;;  %v527_v6 = vld [vmem:[%s1221_s5] sm:$0xff] }
 0x1fe   :  { %796 = vpush %v367_v20  ;;  %v471_v5 = vmul.f32 %v783_v58, %v469_v54  ;;  %v470_v9 = vmul.f32 %v783_v58, %v468_v0 }
 0x1ff   :  { %798 = vpush %v386_v21 }
 0x200   :  { %800 = vpush %v396_v22 }
 0x201   :  { %802 = vpush %v412_v23 }
 0x22f   :  { %s1121_s2 = spop %796 }
 0x230   :  { %s799_s9 = spop %798  ;;  %v374_v46 = vstv %s1121_s2 }
 0x231   :  { %s801_s12 = spop %800  ;;  %v376_v48 = vmul.f32 0.0, %v374_v46 }
 0x232   :  { %s1124_s13 = spop %802 }
 0x233   :  { %s414_s16 = smul.f32 %s1124_s13, %s799_s9 }
 0x234   :  { %s431_s17 = smul.f32 %s1124_s13, %s801_s12 }
 0x235   :  { %s432_s1 = smul.f32 %s414_s16, %s414_s16  ;;  %v448_v30 = vstv %s414_s16 }
 0x236   :  { %v449_v31 = vmul.f32 0.0, %v448_v30  ;;  %v452_v32 = vadd.f32 %v448_v30, %v371_v27 }
 0x237   :  { %s433_s18 = ssub.f32 %s431_s17, %s432_s1 }
 0x238   :  { %v451_v33 = vadd.f32 %v449_v31, %v369_v26  ;;  %v459_v47 = vmul.f32 %v452_v32, %v1088_v61 }
 0x239   :  { %s434_s19 = smax.f32 %s923_s7, %s433_s18 }
 0x23a   :  { %s435_s20 = sadd.f32 1e-05, %s434_s19  ;;  %v458_v49 = vmul.f32 %v451_v33, %v1085_v60  ;;  %v461_v53 = vsub.f32 %v1094_v4, %v459_v47 }
 0x23c   :  { %v436_v34 = vstv %s435_s20  ;;  %v460_v62 = vsub.f32 %v1091_v3, %v458_v49  ;;  %s757_s20 = sshll.u32 %s1222_s6, 4  ;;  %s758_s20 = int_to_ptr.hbm [resolvable:$true] %s757_s20 }
 0x23d   :  { %840 = vrsqrt.f32 %v436_v34  ;;  %vm443_vm1 = vweird.f32 %v436_v34 }
 0x243   :  { %v841_v35 = vpop.eup %840 }
 0x244   :  { %v438_v36 = vmul.f32 %v841_v35, %v436_v34  ;;  %vm444_vm0 = vweird.f32 %v841_v35 }
 0x245   :  { %vm445_vm2 = vmor %vm443_vm1, %vm444_vm0 }
 0x246   :  { %v439_v37 = vmul.f32 %v841_v35, %v438_v36 }
 0x248   :  { %v440_v38 = vmul.f32 0.5, %v439_v37 }
 0x24a   :  { %v441_v39 = vsub.f32 1.5, %v440_v38 }
 0x24c   :  { %v442_v40 = vmul.f32 %v841_v35, %v441_v39 }
 0x24e   :  { %v446_v45 = vsel %vm445_vm2, %v841_v35, %v442_v40  ;;  %v516_v35 = vld [vmem:[%s1220_s4] sm:$0xff] }
 0x24f   :  { %804 = vpush %v446_v45  ;;  %v233_v40 = vld [vmem:[%s1219_s3] sm:$0xff] }
 0x280   :  { %s805_s21 = spop %804 }
 0x281   :  { %v453_v50 = vstv %s805_s21 }
 0x282   :  { %v454_v51 = vmul.f32 0.0, %v453_v50  ;;  %v457_v52 = vadd.f32 %v453_v50, %v376_v48 }
 0x284   :  { %v456_v59 = vadd.f32 %v454_v51, %v374_v46  ;;  %v463_v63 = vmul.f32 %v461_v53, %v457_v52 }
 0x286   :  { %v462_v2 = vmul.f32 %v460_v62, %v456_v59  ;;  %v465_v55 = vmul.f32 0.1, %v463_v63 }
 0x288   :  { %v464_v7 = vmul.f32 0.1, %v462_v2  ;;  %v467_v8 = vmax.f32 %v463_v63, %v465_v55 }
 0x28a   :  { %v466_v10 = vmax.f32 %v462_v2, %v464_v7  ;;  %v473_v11 = vadd.f32 %v471_v5, %v467_v8 }
 0x28c   :  { %v472_v13 = vadd.f32 %v470_v9, %v466_v10  ;;  %498 = vrot.lane.b32.xlu0 %v473_v11, %s917_s10  ;;  %508 = vrot.lane.b32.xlu1 %v473_v11, %s918_s11 }
 0x28e   :  { %496 = vrot.lane.b32.xlu2 %v472_v13, %s917_s10 }
 0x294   :  { %506 = vrot.lane.b32.xlu0 %v472_v13, %s918_s11  ;;  %484 = vrot.lane.b32.xlu1 %v472_v13, %s919_s14 }
 0x296   :  { %474 = vrot.lane.b32.xlu2 %v472_v13, %s920_s15 }
 0x29c   :  { %486 = vrot.lane.b32.xlu0 %v473_v11, %s919_s14  ;;  %476 = vrot.lane.b32.xlu1 %v473_v11, %s920_s15 }
 0x2a4   :  { %530 = vperm.xlu0 %832, %v527_v6  }
 0x2e8   :  { %v497_v3 = vpop.permute.xlu2 %496 }
 0x2f0   :  { %v475_v26 = vpop.permute.xlu2 %474 }
 0x2fe   :  { %v499_v12 = vpop.permute.xlu0 %498  ;;  %v509_v16 = vpop.permute.xlu1 %508 }
 0x2ff   :  { %v500_v15 = vsel %vm145_vm6, %v497_v3, %v499_v12  ;;  %v501_v17 = vsel %vm145_vm6, %v499_v12, %v497_v3 }
 0x300   :  { %v502_v22 = vmul.f32 %v1025_v28, %v500_v15  ;;  %v503_v23 = vmul.f32 %v1028_v29, %v501_v17 }
 0x306   :  { %v507_v4 = vpop.permute.xlu0 %506  ;;  %v485_v14 = vpop.permute.xlu1 %484 }
 0x307   :  { %v510_v18 = vsel %vm153_vm4, %v507_v4, %v509_v16  ;;  %v511_v19 = vsel %vm153_vm4, %v509_v16, %v507_v4 }
 0x308   :  { %v512_v20 = vmul.f32 %v1016_v24, %v510_v18  ;;  %v513_v21 = vmul.f32 %v1019_v25, %v511_v19 }
 0x30a   :  { %547 = vmatpush.msra.mxu2 %v512_v20  ;;  %567 = vmatpush.msra.mxu3 %v513_v21 }
 0x30c   :  { %548 = vmatpush.msra.mxu2 %v502_v22  ;;  %568 = vmatpush.msra.mxu3 %v503_v23 }
 0x30e   :  { %v487_v27 = vpop.permute.xlu0 %486  ;;  %549 = vmatpush.msra.mxu2 %v472_v13  ;;  %569 = vmatpush.msra.mxu3 %v473_v11  ;;  %v477_v30 = vpop.permute.xlu1 %476 }
 0x30f   :  { %v488_v31 = vsel %vm190_vm8, %v485_v14, %v487_v27  ;;  %v489_v24 = vsel %vm190_vm8, %v487_v27, %v485_v14  ;;  %v478_v25 = vsel %vm179_vm13, %v475_v26, %v477_v30  ;;  %v479_v28 = vsel %vm179_vm13, %v477_v30, %v475_v26 }
 0x310   :  { %v490_v29 = vmul.f32 %v1051_v41, %v489_v24  ;;  %v491_v32 = vmul.f32 %v1054_v42, %v488_v31  ;;  %v480_v33 = vmul.f32 %v1058_v43, %v479_v28  ;;  %v481_v34 = vmul.f32 %v1061_v44, %v478_v25 }
 0x312   :  { %550 = vmatpush.msra.mxu2 %v490_v29  ;;  %570 = vmatpush.msra.mxu3 %v491_v32 }
 0x314   :  { %551 = vmatpush.msra.mxu2 %v480_v33  ;;  %571 = vmatpush.msra.mxu3 %v481_v34 }
 0x315   :  { %788 = vmatmul.msk.f32.vlgmr.msra.gmra.mxu2 %vm245_vm14, %v516_v35  ;;  %789 = vmatmul.msk.f32.vlgmr.msra.gmra.mxu3 %vm245_vm14, %v516_v35 }
 0x316   :  { %v531_v1 = vpop.permute.xlu0 %530 }
 0x398   :  { %v553_v41 = vpop.f32.mrf.mxu2  ;;  %v573_v36 = vpop.f32.mrf.mxu3 }
 0x399   :  { %v554_v42 = vadd.f32 %v553_v41, %v531_v1  ;;  %v574_v37 = vadd.f32 %v573_v36, %v531_v1 }
 0x39b   :  { %v1179_v38 = vmul.f32 %v554_v42, %v1085_v60  ;;  %v1182_v43 = vmul.f32 %v574_v37, %v1088_v61 }
 0x39d   :  { %578 = vadd.xlane.f32.xlu2 %v1179_v38  ;;  %657 = vadd.xlane.f32.xlu0 %v1182_v43  ;;  %v587_v44 = vmul.f32 %v1179_v38, %v1179_v38  ;;  %v666_v39 = vmul.f32 %v1182_v43, %v1182_v43 }
 0x39f   :  { %588 = vadd.xlane.f32.xlu1 %v587_v44 }
 0x3a5   :  { %667 = vadd.xlane.f32.xlu2 %v666_v39 }
 0x3b8   :  { %237 = vperm.xlu1 %833, %v233_v40  }
 0x410   :  { %v579_v45 = vpop.xlane.xlu2 %578  ;;  %v658_v0 = vpop.xlane.xlu0 %657 }
 0x411   :  { %v580_v46 = vrot.slane %v579_v45, 4  ;;  %v659_v55 = vrot.slane %v658_v0, 4 }
 0x412   :  { %v589_v47 = vpop.xlane.xlu1 %588 }
 0x413   :  { %v581_v48 = vadd.f32 %v580_v46, %v579_v45  ;;  %v590_v49 = vrot.slane %v589_v47, 4  ;;  %v660_v8 = vadd.f32 %v659_v55, %v658_v0 }
 0x415   :  { %v582_v50 = vrot.slane %v581_v48, 2  ;;  %v591_v51 = vadd.f32 %v590_v49, %v589_v47  ;;  %v661_v10 = vrot.slane %v660_v8, 2 }
 0x417   :  { %v592_v52 = vrot.slane %v591_v51, 2  ;;  %v583_v53 = vadd.f32 %v582_v50, %v581_v48  ;;  %v662_v12 = vadd.f32 %v661_v10, %v660_v8 }
 0x418   :  { %v668_v2 = vpop.xlane.xlu2 %667 }
 0x419   :  { %v584_v54 = vrot.slane %v583_v53, 1  ;;  %v593_v58 = vadd.f32 %v592_v52, %v591_v51  ;;  %v669_v5 = vrot.slane %v668_v2, 4  ;;  %v663_v15 = vrot.slane %v662_v12, 1 }
 0x41b   :  { %v585_v59 = vadd.f32 %v584_v54, %v583_v53  ;;  %v594_v62 = vrot.slane %v593_v58, 1  ;;  %v670_v9 = vadd.f32 %v669_v5, %v668_v2  ;;  %v664_v20 = vadd.f32 %v663_v15, %v662_v12 }
 0x41d   :  { %806 = vpush %v585_v59  ;;  %v595_v63 = vadd.f32 %v594_v62, %v593_v58  ;;  %v671_v13 = vrot.slane %v670_v9, 2 }
 0x41f   :  { %808 = vpush %v595_v63  ;;  %v672_v3 = vadd.f32 %v671_v13, %v670_v9 }
 0x421   :  { %v673_v17 = vrot.slane %v672_v3, 1 }
 0x423   :  { %v674_v21 = vadd.f32 %v673_v17, %v672_v3 }
 0x42a   :  { %v238_v48 = vpop.permute.xlu1 %237 }
 0x42b   :  { %v293_v51 = vadd.f32 %v1080_v57, %v238_v48 }
 0x44e   :  { %s807_s3 = spop %806 }
 0x44f   :  { %s1194_s14 = smul.f32 %s807_s3, %s1106_s26 }
 0x450   :  { %s809_s15 = spop %808 }
 0x451   :  { %s631_s24 = smul.f32 %s1194_s14, %s1194_s14  ;;  %v647_v22 = vstv %s1194_s14 }
 0x452   :  { %s630_s25 = smul.f32 %s809_s15, %s1106_s26  ;;  %v649_v23 = vmul.f32 0.0, %v647_v22 }
 0x454   :  { %s632_s27 = ssub.f32 %s630_s25, %s631_s24 }
 0x456   :  { %s633_s28 = smax.f32 %s923_s7, %s632_s27 }
 0x457   :  { %s634_s29 = sadd.f32 1e-05, %s633_s28 }
 0x459   :  { %v635_v7 = vstv %s634_s29 }
 0x45a   :  { %842 = vrsqrt.f32 %v635_v7  ;;  %vm642_vm6 = vweird.f32 %v635_v7 }
 0x460   :  { %v843_v11 = vpop.eup %842 }
 0x461   :  { %v637_v6 = vmul.f32 %v843_v11, %v635_v7  ;;  %vm643_vm4 = vweird.f32 %v843_v11 }
 0x462   :  { %vm644_vm8 = vmor %vm642_vm6, %vm643_vm4 }
 0x463   :  { %v638_v16 = vmul.f32 %v843_v11, %v637_v6 }
 0x465   :  { %v639_v4 = vmul.f32 0.5, %v638_v16 }
 0x467   :  { %v640_v14 = vsub.f32 1.5, %v639_v4 }
 0x469   :  { %v641_v18 = vmul.f32 %v843_v11, %v640_v14 }
 0x46b   :  { %v645_v19 = vsel %vm644_vm8, %v843_v11, %v641_v18 }
 0x46c   :  { %810 = vpush %v645_v19 }
 0x46d   :  { %812 = vpush %v664_v20 }
 0x46e   :  { %814 = vpush %v674_v21 }
 0x49d   :  { %s1201_s26 = spop %810 }
 0x49e   :  { %s813_s30 = spop %812  ;;  %v652_v1 = vstv %s1201_s26 }
 0x49f   :  { %s692_s0 = smul.f32 %s813_s30, %s1124_s13  ;;  %s815_s8 = spop %814  ;;  %v654_v36 = vmul.f32 0.0, %v652_v1 }
 0x4a0   :  { %s709_s2 = smul.f32 %s815_s8, %s1124_s13  ;;  %s924_s13 = smov [#allocation8]  }
 0x4a1   :  { %s710_s9 = smul.f32 %s692_s0, %s692_s0  ;;  %v726_v26 = vstv %s692_s0  ;;  %s755_s1 = sshll.u32 %s924_s13, 4  ;;  %s756_s1 = int_to_ptr.vmem [resolvable:$true] %s755_s1 }
 0x4a2   :  { %v727_v27 = vmul.f32 0.0, %v726_v26  ;;  %v730_v30 = vadd.f32 %v726_v26, %v649_v23 }
 0x4a3   :  { %s711_s12 = ssub.f32 %s709_s2, %s710_s9 }
 0x4a4   :  { %v729_v31 = vadd.f32 %v727_v27, %v647_v22  ;;  %v737_v41 = vmul.f32 %v730_v30, %v1088_v61 }
 0x4a5   :  { %s712_s16 = smax.f32 %s923_s7, %s711_s12 }
 0x4a6   :  { %s713_s17 = sadd.f32 1e-05, %s712_s16  ;;  %v736_v42 = vmul.f32 %v729_v31, %v1085_v60  ;;  %v739_v40 = vsub.f32 %v1182_v43, %v737_v41  ;;  %v270_v60 = vadd.f32 %v1078_v56, %v238_v48 }
 0x4a8   :  { %v714_v24 = vstv %s713_s17  ;;  %v738_v46 = vsub.f32 %v1179_v38, %v736_v42 }
 0x4a9   :  { %844 = vrsqrt.f32 %v714_v24  ;;  %vm721_vm14 = vweird.f32 %v714_v24 }
 0x4af   :  { %v845_v25 = vpop.eup %844 }
 0x4b0   :  { %v716_v28 = vmul.f32 %v845_v25, %v714_v24  ;;  %vm722_vm13 = vweird.f32 %v845_v25 }
 0x4b1   :  { %vm723_vm5 = vmor %vm721_vm14, %vm722_vm13 }
 0x4b2   :  { %v717_v29 = vmul.f32 %v845_v25, %v716_v28 }
 0x4b4   :  { %v718_v32 = vmul.f32 0.5, %v717_v29 }
 0x4b6   :  { %v719_v33 = vsub.f32 1.5, %v718_v32 }
 0x4b8   :  { %v720_v34 = vmul.f32 %v845_v25, %v719_v33 }
 0x4ba   :  { %v724_v35 = vsel %vm723_vm5, %v845_v25, %v720_v34 }
 0x4bb   :  { %816 = vpush %v724_v35 }
 0x4ec   :  { %s817_s7 = spop %816 }
 0x4ed   :  { %v731_v37 = vstv %s817_s7 }
 0x4ee   :  { %v732_v44 = vmul.f32 0.0, %v731_v37  ;;  %v735_v39 = vadd.f32 %v731_v37, %v654_v36 }
 0x4f0   :  { %v734_v45 = vadd.f32 %v732_v44, %v652_v1  ;;  %v741_v47 = vmul.f32 %v739_v40, %v735_v39 }
 0x4f2   :  { %v740_v49 = vmul.f32 %v738_v46, %v734_v45  ;;  %v743_v50 = vmul.f32 0.1, %v741_v47 }
 0x4f4   :  { %v742_v52 = vmul.f32 0.1, %v740_v49  ;;  %v745_v61 = vmax.f32 %v741_v47, %v743_v50 }
 0x4f6   :  { %v744_v43 = vmax.f32 %v740_v49, %v742_v52  ;;  %v747_v53 = vadd.f32 %v745_v61, %v293_v51 }
 0x4f8   :  { %749 = vst [vmem:[#allocation8 + $0x8] sm:$0xff] %v747_v53  ;;  %v746_v38 = vadd.f32 %v744_v43, %v270_v60 }
 0x4fa   :  { %748 = vst [vmem:[#allocation8] sm:$0xff] %v746_v38 }
 0x4fb   :  { %760 = dma.vmem_to_hbm [thread:$0]  %s756_s1, 256, %s758_s20, [#allocation7]  }
 0x4fc   :  { %910 = dma.done.wait [#allocation7], 256  }
 0x4fd   :  { %911 = vsyncadd [#allocation7], 4294967040 }
 0x4fe   :  { %765 = vsyncpa [#allocation6], 1 }
 0x4ff   :  { %766 = vsyncpa [#allocation7], 1 }

</bundles_post_ra>
